<compile_context>
chip_gen: v5e
topology: v5e:2x2
jax: 0.10.0
libtpu: 0.0.40
codegen_flags: <defaults>
</compile_context>

<pallas_src>
import functools
import math

import jax
import jax.numpy as jnp
from jax import lax
from jax.experimental import pallas as pl
from jax.experimental.pallas import tpu as pltpu


def _msa_kernel(x_ref, w_ref, bias_ref, out_ref, attn_ref, qkv_ref, oacc_ref, *,
                num_heads, head_dim, hidden, factor, tq):
    """Grid step = (batch bi, query-tile qi).

    x_ref    : (1, n, d_in)      VMEM (same block for every qi -> DMA'd once per bi)
    w_ref    : (d_in, 3*hidden)  VMEM fused [Wq | Wk | Wv]
    bias_ref : (1, 3*hidden)     VMEM fused [bq | bk | bv]
    out_ref  : (1, tq, hidden)   VMEM
    attn_ref : (1, H, tq, n)     VMEM
    qkv_ref  : (n, 3*hidden) f32 scratch, persists across the qi axis
    oacc_ref : (tq, hidden)  f32 scratch, lane-dense output staging
    """
    qi = pl.program_id(1)

    # Fused QKV projection: one MXU pass with N = 3*hidden, computed once per
    # batch element and cached for the remaining query tiles.
    @pl.when(qi == 0)
    def _():
        qkv_ref[...] = (
            jnp.dot(x_ref[0], w_ref[...], preferred_element_type=jnp.float32)
            + bias_ref[...])

    q_start = pl.multiple_of(qi * tq, tq)
    q = qkv_ref[pl.ds(q_start, tq), :][:, :hidden] * factor      # (tq, hidden), pre-scaled
    kv = qkv_ref[...]
    k = kv[:, hidden:2 * hidden]                                 # (n, hidden)
    v = kv[:, 2 * hidden:]                                       # (n, hidden)

    for h in range(num_heads):
        lo = h * head_dim
        hi = lo + head_dim
        qh = q[:, lo:hi]      # (tq, p)
        kh = k[:, lo:hi]      # (n,  p)
        vh = v[:, lo:hi]      # (n,  p)

        # scores[i, j] = sum_d q[i, d] * k[j, d]  -- contract last dims, no transpose
        s = lax.dot_general(qh, kh, (((1,), (1,)), ((), ())),
                            preferred_element_type=jnp.float32)   # (tq, n)

        # numerically stable softmax over the key axis
        m = jnp.max(s, axis=-1, keepdims=True)
        e = jnp.exp(s - m)
        denom = jnp.sum(e, axis=-1, keepdims=True)
        inv = pl.reciprocal(denom, approx=True)       # EUP slot
        inv = inv * (2.0 - denom * inv)               # one Newton step -> ~exact f32
        a = e * inv                                   # (tq, n)

        attn_ref[0, h] = a.astype(attn_ref.dtype)     # lane-dense (n on lanes)

        # out tile columns for this head
        oacc_ref[:, lo:hi] = jnp.dot(a, vh, preferred_element_type=jnp.float32)

    # single unmasked full-width store of the concatenated-heads output tile
    out_ref[0] = oacc_ref[...].astype(out_ref.dtype)


def _pick_query_tile(n, max_tq=256):
    """Largest query tile <= max_tq that divides n (whole n if n is small)."""
    if n <= max_tq:
        return n
    t = max_tq
    while t >= 8:
        if n % t == 0:
            return t
        t -= 8
    return n  # TODO(synk): ragged-tail masking when n has no multiple-of-8 divisor


def msa_forward(x, params, num_heads):
    """Pallas MSA forward.  Returns (out [b,n,hidden], attn [b,H,n,n])."""
    b, n, d_in = x.shape
    hidden = params["wq"].shape[1]
    assert hidden % num_heads == 0
    head_dim = hidden // num_heads
    factor = 1.0 / math.sqrt(head_dim)
    tq = _pick_query_tile(n)

    # Fuse the three projections into a single (d_in, 3*hidden) matmul operand.
    w_qkv = jnp.concatenate([params["wq"], params["wk"], params["wv"]], axis=1)
    b_qkv = jnp.concatenate([params["bq"], params["bk"], params["bv"]], axis=1)

    kernel = functools.partial(
        _msa_kernel, num_heads=num_heads, head_dim=head_dim, hidden=hidden,
        factor=factor, tq=tq)

    flops = 2 * b * n * d_in * 3 * hidden + 4 * b * num_heads * n * n * head_dim
    bytes_accessed = 4 * (b * n * d_in + d_in * 3 * hidden + 3 * hidden
                          + b * n * hidden + b * num_heads * n * n)

    out, attn = pl.pallas_call(
        kernel,
        out_shape=(
            jax.ShapeDtypeStruct((b, n, hidden), x.dtype),
            jax.ShapeDtypeStruct((b, num_heads, n, n), x.dtype),
        ),
        grid=(b, n // tq),
        in_specs=[
            pl.BlockSpec((1, n, d_in), lambda bi, qi: (bi, 0, 0)),
            pl.BlockSpec((d_in, 3 * hidden), lambda bi, qi: (0, 0)),
            pl.BlockSpec((1, 3 * hidden), lambda bi, qi: (0, 0)),
        ],
        out_specs=(
            pl.BlockSpec((1, tq, hidden), lambda bi, qi: (bi, qi, 0)),
            pl.BlockSpec((1, num_heads, tq, n), lambda bi, qi: (bi, 0, qi, 0)),
        ),
        scratch_shapes=[
            pltpu.VMEM((n, 3 * hidden), jnp.float32),   # cached fused QKV
            pltpu.VMEM((tq, hidden), jnp.float32),      # lane-dense out staging
        ],
        compiler_params=pltpu.CompilerParams(
            dimension_semantics=("parallel", "arbitrary"),
            vmem_limit_bytes=48 * 1024 * 1024),
        cost_estimate=pl.CostEstimate(
            flops=flops,
            transcendentals=b * num_heads * n * n,
            bytes_accessed=bytes_accessed),
    )(x, w_qkv, b_qkv)
    return out, attn


def init_params(key, input_dim, hidden_dim):
    """Deterministic nn.Linear-style init: U(-1/sqrt(fan_in), 1/sqrt(fan_in))."""
    bound = 1.0 / math.sqrt(input_dim)
    ks = jax.random.split(key, 6)

    def u(k, shape):
        return jax.random.uniform(k, shape, jnp.float32, -bound, bound)

    return {
        "wq": u(ks[0], (input_dim, hidden_dim)),
        "bq": u(ks[1], (1, hidden_dim)),
        "wk": u(ks[2], (input_dim, hidden_dim)),
        "bk": u(ks[3], (1, hidden_dim)),
        "wv": u(ks[4], (input_dim, hidden_dim)),
        "bv": u(ks[5], (1, hidden_dim)),
    }


def msa_reference(x, params, num_heads):
    """Pure-JAX reference mirroring the PyTorch einsum semantics."""
    b, n, _ = x.shape
    hidden = params["wq"].shape[1]
    head_dim = hidden // num_heads
    factor = 1.0 / math.sqrt(head_dim)
    q = (x @ params["wq"] + params["bq"]).reshape(b, n, num_heads, head_dim)
    k = (x @ params["wk"] + params["bk"]).reshape(b, n, num_heads, head_dim)
    v = (x @ params["wv"] + params["bv"]).reshape(b, n, num_heads, head_dim)
    raw = jnp.einsum("bihd,bjhd->bhij", q, k)
    scores = jax.nn.softmax(raw * factor, axis=-1)
    out = jnp.einsum("bhij,bjhp->bihp", scores, v)
    return out.reshape(b, n, -1), scores


if __name__ == "__main__":
    # Small shapes consistent with the module: b=2, n=8, input_dim=16,
    # hidden_dim=32, num_heads=4 (head_dim=8).
    b, n, input_dim = 2, 8, 16
    hidden_dim, num_heads = 32, 4

    key = jax.random.PRNGKey(0)
    kx, kp = jax.random.split(key)
    x = jax.random.normal(kx, (b, n, input_dim), jnp.float32)
    params = init_params(kp, input_dim, hidden_dim)

    out, attn = msa_forward(x, params, num_heads)
    out = jax.block_until_ready(out)
    attn = jax.block_until_ready(attn)

    ref_out, ref_attn = msa_reference(x, params, num_heads)
    assert out.shape == (b, n, hidden_dim)
    assert attn.shape == (b, num_heads, n, n)
    assert jnp.allclose(out, ref_out, atol=1e-4, rtol=1e-4)
    assert jnp.allclose(attn, ref_attn, atol=1e-4, rtol=1e-4)

    print("KERNEL_OK")
</pallas_src>

<mosaic_0001>
module attributes {stable_mosaic.version = 11 : i64} {
  func.func @_msa_kernel(%arg0: i32, %arg1: i32, %arg2: memref<1x8x16xf32, #tpu.memory_space<vmem>>, %arg3: memref<16x96xf32, #tpu.memory_space<vmem>>, %arg4: memref<1x96xf32, #tpu.memory_space<vmem>>, %arg5: memref<1x8x32xf32, #tpu.memory_space<vmem>>, %arg6: memref<1x4x8x8xf32, #tpu.memory_space<vmem>>, %arg7: memref<8x96xf32, #tpu.memory_space<vmem>>, %arg8: memref<8x32xf32, #tpu.memory_space<vmem>>) attributes {dimension_semantics = [#tpu.dimension_semantics<parallel>, #tpu.dimension_semantics<arbitrary>], iteration_bounds = array<i64: 2, 1>, scalar_prefetch = 0 : i64, scratch_operands = 2 : i64, tpu.core_type = #tpu.core_type<tc>, window_params = [{transform_indices = @transform_0, window_bounds = array<i64: 1, 8, 16>}, {pipeline_mode = #tpu.pipeline_mode<synchronous>, transform_indices = @transform_1, window_bounds = array<i64: 16, 96>}, {pipeline_mode = #tpu.pipeline_mode<synchronous>, transform_indices = @transform_2, window_bounds = array<i64: 1, 96>}, {transform_indices = @transform_3, window_bounds = array<i64: 1, 8, 32>}, {transform_indices = @transform_4, window_bounds = array<i64: 1, 4, 8, 8>}]} {
    %c0_i32 = arith.constant 0 : i32
    %0 = arith.cmpi eq, %arg1, %c0_i32 : i32
    %1 = arith.extui %0 : i1 to i32
    %c0_i32_0 = arith.constant 0 : i32
    %2 = arith.cmpi ne, %1, %c0_i32_0 : i32
    scf.if %2 {
      %c0_46 = arith.constant 0 : index
      %c0_47 = arith.constant 0 : index
      %c0_48 = arith.constant 0 : index
      %109 = vector.load %arg2[%c0_46, %c0_47, %c0_48] : memref<1x8x16xf32, #tpu.memory_space<vmem>>, vector<1x8x16xf32>
      %110 = vector.shape_cast %109 : vector<1x8x16xf32> to vector<8x16xf32>
      %c0_49 = arith.constant 0 : index
      %c0_50 = arith.constant 0 : index
      %111 = vector.load %arg3[%c0_49, %c0_50] : memref<16x96xf32, #tpu.memory_space<vmem>>, vector<16x96xf32>
      %cst_51 = arith.constant dense<0.000000e+00> : vector<8x96xf32>
      %112 = tpu.matmul %110, %111, %cst_51 {dimension_numbers = #tpu.dot_dimension_numbers<[1], [0], [0], [1], [0, 0, 1, 1], [], []>} : vector<8x16xf32>, vector<16x96xf32>, vector<8x96xf32> -> vector<8x96xf32>
      %c0_52 = arith.constant 0 : index
      %c0_53 = arith.constant 0 : index
      %113 = vector.load %arg4[%c0_52, %c0_53] : memref<1x96xf32, #tpu.memory_space<vmem>>, vector<1x96xf32>
      %114 = vector.broadcast %113 : vector<1x96xf32> to vector<8x96xf32>
      %115 = arith.addf %112, %114 : vector<8x96xf32>
      %c0_54 = arith.constant 0 : index
      %c0_55 = arith.constant 0 : index
      %116 = vector.load %arg7[%c0_54, %c0_55] : memref<8x96xf32, #tpu.memory_space<vmem>>, vector<8x96xf32>
      tpu.vector_store %arg7[%c0_54, %c0_55], %115 {strides = array<i32>} : memref<8x96xf32, #tpu.memory_space<vmem>>, vector<8x96xf32>,
    } else {
    }
    %c8_i32 = arith.constant 8 : i32
    %3 = arith.muli %arg1, %c8_i32 : i32
    %4 = tpu.assume_multiple %3, 8 : i32
    %5 = arith.index_cast %4 : i32 to index
    %c0 = arith.constant 0 : index
    %6 = vector.load %arg7[%5, %c0] : memref<8x96xf32, #tpu.memory_space<vmem>>, vector<8x96xf32>
    %7 = vector.extract_strided_slice %6 {offsets = [0, 0], sizes = [8, 32], strides = [1, 1]} : vector<8x96xf32> to vector<8x32xf32>
    %cst = arith.constant 0.353553385 : f32
    %8 = vector.broadcast %cst : f32 to vector<8x32xf32>
    %9 = arith.mulf %7, %8 : vector<8x32xf32>
    %c0_1 = arith.constant 0 : index
    %c0_2 = arith.constant 0 : index
    %10 = vector.load %arg7[%c0_1, %c0_2] : memref<8x96xf32, #tpu.memory_space<vmem>>, vector<8x96xf32>
    %11 = vector.extract_strided_slice %10 {offsets = [0, 32], sizes = [8, 32], strides = [1, 1]} : vector<8x96xf32> to vector<8x32xf32>
    %12 = vector.extract_strided_slice %10 {offsets = [0, 64], sizes = [8, 32], strides = [1, 1]} : vector<8x96xf32> to vector<8x32xf32>
    %13 = vector.extract_strided_slice %9 {offsets = [0, 0], sizes = [8, 8], strides = [1, 1]} : vector<8x32xf32> to vector<8x8xf32>
    %14 = vector.extract_strided_slice %11 {offsets = [0, 0], sizes = [8, 8], strides = [1, 1]} : vector<8x32xf32> to vector<8x8xf32>
    %15 = vector.extract_strided_slice %12 {offsets = [0, 0], sizes = [8, 8], strides = [1, 1]} : vector<8x32xf32> to vector<8x8xf32>
    %cst_3 = arith.constant dense<0.000000e+00> : vector<8x8xf32>
    %16 = tpu.matmul %13, %14, %cst_3 {dimension_numbers = #tpu.dot_dimension_numbers<[1], [1], [0], [0], [0, 0, 1, 0], [], []>} : vector<8x8xf32>, vector<8x8xf32>, vector<8x8xf32> -> vector<8x8xf32>
    %cst_4 = arith.constant dense<0xFF800000> : vector<8xf32>
    %17 = vector.multi_reduction <maximumf>, %16, %cst_4 [1] : vector<8x8xf32> to vector<8xf32>
    %18 = vector.shape_cast %17 : vector<8xf32> to vector<8x1xf32>
    %19 = vector.broadcast %18 : vector<8x1xf32> to vector<8x8xf32>
    %20 = arith.subf %16, %19 : vector<8x8xf32>
    %21 = math.exp %20 : vector<8x8xf32>
    %cst_5 = arith.constant dense<0.000000e+00> : vector<8xf32>
    %22 = vector.multi_reduction <add>, %21, %cst_5 [1] : vector<8x8xf32> to vector<8xf32>
    %23 = vector.shape_cast %22 : vector<8xf32> to vector<8x1xf32>
    %24 = tpu.reciprocal %23 {approx = true} : vector<8x1xf32> -> vector<8x1xf32>
    %25 = arith.mulf %23, %24 : vector<8x1xf32>
    %cst_6 = arith.constant 2.000000e+00 : f32
    %26 = vector.broadcast %cst_6 : f32 to vector<8x1xf32>
    %27 = arith.subf %26, %25 : vector<8x1xf32>
    %28 = arith.mulf %24, %27 : vector<8x1xf32>
    %29 = vector.broadcast %28 : vector<8x1xf32> to vector<8x8xf32>
    %30 = arith.mulf %21, %29 : vector<8x8xf32>
    %c0_7 = arith.constant 0 : index
    %c0_8 = arith.constant 0 : index
    %c0_9 = arith.constant 0 : index
    %c0_10 = arith.constant 0 : index
    %31 = vector.load %arg6[%c0_7, %c0_8, %c0_9, %c0_10] : memref<1x4x8x8xf32, #tpu.memory_space<vmem>>, vector<1x1x8x8xf32>
    %32 = vector.shape_cast %31 : vector<1x1x8x8xf32> to vector<8x8xf32>
    %33 = vector.shape_cast %30 : vector<8x8xf32> to vector<1x1x8x8xf32>
    tpu.vector_store %arg6[%c0_7, %c0_8, %c0_9, %c0_10], %33 {strides = array<i32>} : memref<1x4x8x8xf32, #tpu.memory_space<vmem>>, vector<1x1x8x8xf32>,
    %cst_11 = arith.constant dense<0.000000e+00> : vector<8x8xf32>
    %34 = tpu.matmul %30, %15, %cst_11 {dimension_numbers = #tpu.dot_dimension_numbers<[1], [0], [0], [1], [0, 0, 1, 1], [], []>} : vector<8x8xf32>, vector<8x8xf32>, vector<8x8xf32> -> vector<8x8xf32>
    %c0_12 = arith.constant 0 : index
    %c0_13 = arith.constant 0 : index
    %35 = vector.load %arg8[%c0_12, %c0_13] : memref<8x32xf32, #tpu.memory_space<vmem>>, vector<8x8xf32>
    tpu.vector_store %arg8[%c0_12, %c0_13], %34 {strides = array<i32>} : memref<8x32xf32, #tpu.memory_space<vmem>>, vector<8x8xf32>,
    %36 = vector.extract_strided_slice %9 {offsets = [0, 8], sizes = [8, 8], strides = [1, 1]} : vector<8x32xf32> to vector<8x8xf32>
    %37 = vector.extract_strided_slice %11 {offsets = [0, 8], sizes = [8, 8], strides = [1, 1]} : vector<8x32xf32> to vector<8x8xf32>
    %38 = vector.extract_strided_slice %12 {offsets = [0, 8], sizes = [8, 8], strides = [1, 1]} : vector<8x32xf32> to vector<8x8xf32>
    %cst_14 = arith.constant dense<0.000000e+00> : vector<8x8xf32>
    %39 = tpu.matmul %36, %37, %cst_14 {dimension_numbers = #tpu.dot_dimension_numbers<[1], [1], [0], [0], [0, 0, 1, 0], [], []>} : vector<8x8xf32>, vector<8x8xf32>, vector<8x8xf32> -> vector<8x8xf32>
    %cst_15 = arith.constant dense<0xFF800000> : vector<8xf32>
    %40 = vector.multi_reduction <maximumf>, %39, %cst_15 [1] : vector<8x8xf32> to vector<8xf32>
    %41 = vector.shape_cast %40 : vector<8xf32> to vector<8x1xf32>
    %42 = vector.broadcast %41 : vector<8x1xf32> to vector<8x8xf32>
    %43 = arith.subf %39, %42 : vector<8x8xf32>
    %44 = math.exp %43 : vector<8x8xf32>
    %cst_16 = arith.constant dense<0.000000e+00> : vector<8xf32>
    %45 = vector.multi_reduction <add>, %44, %cst_16 [1] : vector<8x8xf32> to vector<8xf32>
    %46 = vector.shape_cast %45 : vector<8xf32> to vector<8x1xf32>
    %47 = tpu.reciprocal %46 {approx = true} : vector<8x1xf32> -> vector<8x1xf32>
    %48 = arith.mulf %46, %47 : vector<8x1xf32>
    %cst_17 = arith.constant 2.000000e+00 : f32
    %49 = vector.broadcast %cst_17 : f32 to vector<8x1xf32>
    %50 = arith.subf %49, %48 : vector<8x1xf32>
    %51 = arith.mulf %47, %50 : vector<8x1xf32>
    %52 = vector.broadcast %51 : vector<8x1xf32> to vector<8x8xf32>
    %53 = arith.mulf %44, %52 : vector<8x8xf32>
    %c0_18 = arith.constant 0 : index
    %c1 = arith.constant 1 : index
    %c0_19 = arith.constant 0 : index
    %c0_20 = arith.constant 0 : index
    %54 = vector.load %arg6[%c0_18, %c1, %c0_19, %c0_20] : memref<1x4x8x8xf32, #tpu.memory_space<vmem>>, vector<1x1x8x8xf32>
    %55 = vector.shape_cast %54 : vector<1x1x8x8xf32> to vector<8x8xf32>
    %56 = vector.shape_cast %53 : vector<8x8xf32> to vector<1x1x8x8xf32>
    tpu.vector_store %arg6[%c0_18, %c1, %c0_19, %c0_20], %56 {strides = array<i32>} : memref<1x4x8x8xf32, #tpu.memory_space<vmem>>, vector<1x1x8x8xf32>,
    %cst_21 = arith.constant dense<0.000000e+00> : vector<8x8xf32>
    %57 = tpu.matmul %53, %38, %cst_21 {dimension_numbers = #tpu.dot_dimension_numbers<[1], [0], [0], [1], [0, 0, 1, 1], [], []>} : vector<8x8xf32>, vector<8x8xf32>, vector<8x8xf32> -> vector<8x8xf32>
    %c0_22 = arith.constant 0 : index
    %c8 = arith.constant 8 : index
    %58 = vector.load %arg8[%c0_22, %c8] : memref<8x32xf32, #tpu.memory_space<vmem>>, vector<8x8xf32>
    tpu.vector_store %arg8[%c0_22, %c8], %57 {strides = array<i32>} : memref<8x32xf32, #tpu.memory_space<vmem>>, vector<8x8xf32>,
    %59 = vector.extract_strided_slice %9 {offsets = [0, 16], sizes = [8, 8], strides = [1, 1]} : vector<8x32xf32> to vector<8x8xf32>
    %60 = vector.extract_strided_slice %11 {offsets = [0, 16], sizes = [8, 8], strides = [1, 1]} : vector<8x32xf32> to vector<8x8xf32>
    %61 = vector.extract_strided_slice %12 {offsets = [0, 16], sizes = [8, 8], strides = [1, 1]} : vector<8x32xf32> to vector<8x8xf32>
    %cst_23 = arith.constant dense<0.000000e+00> : vector<8x8xf32>
    %62 = tpu.matmul %59, %60, %cst_23 {dimension_numbers = #tpu.dot_dimension_numbers<[1], [1], [0], [0], [0, 0, 1, 0], [], []>} : vector<8x8xf32>, vector<8x8xf32>, vector<8x8xf32> -> vector<8x8xf32>
    %cst_24 = arith.constant dense<0xFF800000> : vector<8xf32>
    %63 = vector.multi_reduction <maximumf>, %62, %cst_24 [1] : vector<8x8xf32> to vector<8xf32>
    %64 = vector.shape_cast %63 : vector<8xf32> to vector<8x1xf32>
    %65 = vector.broadcast %64 : vector<8x1xf32> to vector<8x8xf32>
    %66 = arith.subf %62, %65 : vector<8x8xf32>
    %67 = math.exp %66 : vector<8x8xf32>
    %cst_25 = arith.constant dense<0.000000e+00> : vector<8xf32>
    %68 = vector.multi_reduction <add>, %67, %cst_25 [1] : vector<8x8xf32> to vector<8xf32>
    %69 = vector.shape_cast %68 : vector<8xf32> to vector<8x1xf32>
    %70 = tpu.reciprocal %69 {approx = true} : vector<8x1xf32> -> vector<8x1xf32>
    %71 = arith.mulf %69, %70 : vector<8x1xf32>
    %cst_26 = arith.constant 2.000000e+00 : f32
    %72 = vector.broadcast %cst_26 : f32 to vector<8x1xf32>
    %73 = arith.subf %72, %71 : vector<8x1xf32>
    %74 = arith.mulf %70, %73 : vector<8x1xf32>
    %75 = vector.broadcast %74 : vector<8x1xf32> to vector<8x8xf32>
    %76 = arith.mulf %67, %75 : vector<8x8xf32>
    %c0_27 = arith.constant 0 : index
    %c2 = arith.constant 2 : index
    %c0_28 = arith.constant 0 : index
    %c0_29 = arith.constant 0 : index
    %77 = vector.load %arg6[%c0_27, %c2, %c0_28, %c0_29] : memref<1x4x8x8xf32, #tpu.memory_space<vmem>>, vector<1x1x8x8xf32>
    %78 = vector.shape_cast %77 : vector<1x1x8x8xf32> to vector<8x8xf32>
    %79 = vector.shape_cast %76 : vector<8x8xf32> to vector<1x1x8x8xf32>
    tpu.vector_store %arg6[%c0_27, %c2, %c0_28, %c0_29], %79 {strides = array<i32>} : memref<1x4x8x8xf32, #tpu.memory_space<vmem>>, vector<1x1x8x8xf32>,
    %cst_30 = arith.constant dense<0.000000e+00> : vector<8x8xf32>
    %80 = tpu.matmul %76, %61, %cst_30 {dimension_numbers = #tpu.dot_dimension_numbers<[1], [0], [0], [1], [0, 0, 1, 1], [], []>} : vector<8x8xf32>, vector<8x8xf32>, vector<8x8xf32> -> vector<8x8xf32>
    %c0_31 = arith.constant 0 : index
    %c16 = arith.constant 16 : index
    %81 = vector.load %arg8[%c0_31, %c16] : memref<8x32xf32, #tpu.memory_space<vmem>>, vector<8x8xf32>
    tpu.vector_store %arg8[%c0_31, %c16], %80 {strides = array<i32>} : memref<8x32xf32, #tpu.memory_space<vmem>>, vector<8x8xf32>,
    %82 = vector.extract_strided_slice %9 {offsets = [0, 24], sizes = [8, 8], strides = [1, 1]} : vector<8x32xf32> to vector<8x8xf32>
    %83 = vector.extract_strided_slice %11 {offsets = [0, 24], sizes = [8, 8], strides = [1, 1]} : vector<8x32xf32> to vector<8x8xf32>
    %84 = vector.extract_strided_slice %12 {offsets = [0, 24], sizes = [8, 8], strides = [1, 1]} : vector<8x32xf32> to vector<8x8xf32>
    %cst_32 = arith.constant dense<0.000000e+00> : vector<8x8xf32>
    %85 = tpu.matmul %82, %83, %cst_32 {dimension_numbers = #tpu.dot_dimension_numbers<[1], [1], [0], [0], [0, 0, 1, 0], [], []>} : vector<8x8xf32>, vector<8x8xf32>, vector<8x8xf32> -> vector<8x8xf32>
    %cst_33 = arith.constant dense<0xFF800000> : vector<8xf32>
    %86 = vector.multi_reduction <maximumf>, %85, %cst_33 [1] : vector<8x8xf32> to vector<8xf32>
    %87 = vector.shape_cast %86 : vector<8xf32> to vector<8x1xf32>
    %88 = vector.broadcast %87 : vector<8x1xf32> to vector<8x8xf32>
    %89 = arith.subf %85, %88 : vector<8x8xf32>
    %90 = math.exp %89 : vector<8x8xf32>
    %cst_34 = arith.constant dense<0.000000e+00> : vector<8xf32>
    %91 = vector.multi_reduction <add>, %90, %cst_34 [1] : vector<8x8xf32> to vector<8xf32>
    %92 = vector.shape_cast %91 : vector<8xf32> to vector<8x1xf32>
    %93 = tpu.reciprocal %92 {approx = true} : vector<8x1xf32> -> vector<8x1xf32>
    %94 = arith.mulf %92, %93 : vector<8x1xf32>
    %cst_35 = arith.constant 2.000000e+00 : f32
    %95 = vector.broadcast %cst_35 : f32 to vector<8x1xf32>
    %96 = arith.subf %95, %94 : vector<8x1xf32>
    %97 = arith.mulf %93, %96 : vector<8x1xf32>
    %98 = vector.broadcast %97 : vector<8x1xf32> to vector<8x8xf32>
    %99 = arith.mulf %90, %98 : vector<8x8xf32>
    %c0_36 = arith.constant 0 : index
    %c3 = arith.constant 3 : index
    %c0_37 = arith.constant 0 : index
    %c0_38 = arith.constant 0 : index
    %100 = vector.load %arg6[%c0_36, %c3, %c0_37, %c0_38] : memref<1x4x8x8xf32, #tpu.memory_space<vmem>>, vector<1x1x8x8xf32>
    %101 = vector.shape_cast %100 : vector<1x1x8x8xf32> to vector<8x8xf32>
    %102 = vector.shape_cast %99 : vector<8x8xf32> to vector<1x1x8x8xf32>
    tpu.vector_store %arg6[%c0_36, %c3, %c0_37, %c0_38], %102 {strides = array<i32>} : memref<1x4x8x8xf32, #tpu.memory_space<vmem>>, vector<1x1x8x8xf32>,
    %cst_39 = arith.constant dense<0.000000e+00> : vector<8x8xf32>
    %103 = tpu.matmul %99, %84, %cst_39 {dimension_numbers = #tpu.dot_dimension_numbers<[1], [0], [0], [1], [0, 0, 1, 1], [], []>} : vector<8x8xf32>, vector<8x8xf32>, vector<8x8xf32> -> vector<8x8xf32>
    %c0_40 = arith.constant 0 : index
    %c24 = arith.constant 24 : index
    %104 = vector.load %arg8[%c0_40, %c24] : memref<8x32xf32, #tpu.memory_space<vmem>>, vector<8x8xf32>
    tpu.vector_store %arg8[%c0_40, %c24], %103 {strides = array<i32>} : memref<8x32xf32, #tpu.memory_space<vmem>>, vector<8x8xf32>,
    %c0_41 = arith.constant 0 : index
    %c0_42 = arith.constant 0 : index
    %105 = vector.load %arg8[%c0_41, %c0_42] : memref<8x32xf32, #tpu.memory_space<vmem>>, vector<8x32xf32>
    %c0_43 = arith.constant 0 : index
    %c0_44 = arith.constant 0 : index
    %c0_45 = arith.constant 0 : index
    %106 = vector.load %arg5[%c0_43, %c0_44, %c0_45] : memref<1x8x32xf32, #tpu.memory_space<vmem>>, vector<1x8x32xf32>
    %107 = vector.shape_cast %106 : vector<1x8x32xf32> to vector<8x32xf32>
    %108 = vector.shape_cast %105 : vector<8x32xf32> to vector<1x8x32xf32>
    tpu.vector_store %arg5[%c0_43, %c0_44, %c0_45], %108 {strides = array<i32>} : memref<1x8x32xf32, #tpu.memory_space<vmem>>, vector<1x8x32xf32>,
    return
  }
  func.func @transform_0(%arg0: i32, %arg1: i32) -> (i32, i32, i32) {
    %c0_i32 = arith.constant 0 : i32
    %c0_i32_0 = arith.constant 0 : i32
    %c0_i32_1 = arith.constant 0 : i32
    return %arg0, %c0_i32, %c0_i32_0 : i32, i32, i32
  }
  func.func @transform_1(%arg0: i32, %arg1: i32) -> (i32, i32) {
    %c0_i32 = arith.constant 0 : i32
    %c0_i32_0 = arith.constant 0 : i32
    %c0_i32_1 = arith.constant 0 : i32
    return %c0_i32, %c0_i32_0 : i32, i32
  }
  func.func @transform_2(%arg0: i32, %arg1: i32) -> (i32, i32) {
    %c0_i32 = arith.constant 0 : i32
    %c0_i32_0 = arith.constant 0 : i32
    %c0_i32_1 = arith.constant 0 : i32
    return %c0_i32, %c0_i32_0 : i32, i32
  }
  func.func @transform_3(%arg0: i32, %arg1: i32) -> (i32, i32, i32) {
    %c0_i32 = arith.constant 0 : i32
    %c0_i32_0 = arith.constant 0 : i32
    return %arg0, %arg1, %c0_i32 : i32, i32, i32
  }
  func.func @transform_4(%arg0: i32, %arg1: i32) -> (i32, i32, i32, i32) {
    %c0_i32 = arith.constant 0 : i32
    %c0_i32_0 = arith.constant 0 : i32
    %c0_i32_1 = arith.constant 0 : i32
    return %arg0, %c0_i32, %arg1, %c0_i32_0 : i32, i32, i32, i32
  }
}

</mosaic_0001>

<bundles_post_ra>
// kernel: tpu_custom_call.1
= control target key start
LH: loop header
LB: loop body
LE: loop exit
PB: predicated region body
PF: predicated region fallthrough
CT: control target
= control target key end

     0   :  { %10 = vsyncpa [#allocation5], 0  ;;  %s1351_s0 = inlined_call_operand.hbm [shape: f32[2,8,16], index: 0, kind: input, shape index: {}]   ;;  %s1352_s1 = inlined_call_operand.hbm [shape: f32[16,96], index: 1, kind: input, shape index: {}]   ;;  %s1353_s2 = inlined_call_operand.vmem [shape: f32[1,96], index: 2, kind: input, shape index: {}]   ;;  %s1354_s3 = inlined_call_operand.hbm [shape: f32[2,8,32], index: 3, kind: output, shape index: {0}]   ;;  %s1355_s4 = inlined_call_operand.hbm [shape: f32[2,4,8,8], index: 4, kind: output, shape index: {1}]  }
   0x1   :  { %12 = vsyncpa [#allocation5 + $0x1], 0 }
   0x2   :  { %13 = vsyncpa [#allocation8], 0 }
   0x3   :  { %14 = vsyncpa [#allocation6], 0 }
   0x4   :  { %16 = vsyncpa [#allocation6 + $0x1], 0 }
   0x5   :  { %17 = vsyncpa [#allocation11], 0 }
   0x6   :  { %19 = vsyncpa [#allocation11 + $0x1], 0  ;;  %s1140_s15 = smov 0   ;;  %s1142_s16 = smov 0  }
   0x7   :  { %s1144_s17 = smov 0   ;;  %s1146_s18 = smov 0  }
   0x8   :  { %s1148_s19 = smov 0   ;;  %s1150_s20 = smov 0  }
   0x9 LB: > { %s769_s21 = sadd.s32 4294967295, %s1095_s20   ;;  %p771_p0 = scmp.ge.s32.totalorder %s1095_s20, 1  ;;  %s1095_s20 = sphi %s1150_s20, %s25_s20   ;;  %s1091_s19 = sphi %s1148_s19, %s1366_s19   ;;  %s1087_s18 = sphi %s1146_s18, %s1365_s18   ;;  %s1083_s17 = sphi %s1144_s17, %s1364_s17   ;;  %s1079_s16 = sphi %s1142_s16, %s1363_s16   ;;  %s1075_s15 = sphi %s1140_s15, %s1362_s15  }
   0xa   : > { %p1172_p1 = scmp.eq.s32.totalorder %s769_s21, 0  ;;  %p166_p2 = scmp.lt.s32.totalorder %s1095_s20, 3 }
   0xb   : > { %s177_s25 = sshll.u32 %s1352_s1, 4  ;;  %s1097_s27 = smov [#allocation7]   ;;  %s178_s25 = int_to_ptr.hbm [resolvable:$true] %s177_s25 }
   0xc   : > { %p1180_p3 = pnand %p771_p0, %p166_p2  ;;  %s179_s28 = sshll.u32 %s1097_s27, 4  ;;  %s180_s28 = int_to_ptr.vmem [resolvable:$true] %s179_s28 }
   0xd   : > { %p773_p6 = scmp.ge.s32.totalorder %s1095_s20, 2  ;;  %s1098_s29 = smov 128  }
   0xe   : > { %p815_p4 = pneg %p1180_p3  ;;  %s1099_s30 = smov 8  }
   0xf   : > { %s770_s5 = sadd.s32 4294967294, %s1095_s20   ;;  %s37_s6 = sadd.s32 1, %s1091_s19 }
  0x10   : > { %p816_p5 = pnand %p815_p4, %p1172_p1  ;;  %s44_s7 = sadd.s32 1, %s1083_s17 }
  0x11   : > { %p39_p7 = scmp.ge.s32.totalorder %s37_s6, 2  ;;  %p51_p8 = scmp.ne.s32.totalorder %s1083_s17, %s1079_s16 }
  0x12   : > { %818 = dma.hbm_to_vmem [thread:$0]  (!%p816_p5), %s178_s25, 256, %s180_s28, [#allocation8], %s1098_s29, %s1098_s29, %s1099_s30  }
  0x13   : > { %p52_p9 = scmp.eq.s32.totalorder %s1095_s20, 0  ;;  %p57_p10 = scmp.ne.s32.totalorder %s1079_s16, %s1075_s15 }
  0x14   : > { %s1368_s6 = smov (%p39_p7, %s37_s6), 0  ;;  %p125_p13 = scmp.eq.s32.totalorder %s769_s21, 1 }
  0x15   : > { %p1199_p11 = por %p52_p9, %p51_p8  ;;  %p1205_p12 = por %p1172_p1, %p57_p10 }
  0x16   : > { %s41_s10 = ssub.s32 %s1091_s19, %s1368_s6  ;;  %p131_p2 = scmp.eq.s32.totalorder %s770_s5, 1 }
  0x17   : > { %p42_p0 = scmp.eq.s32.totalorder %s41_s10, 0  ;;  %p1211_p4 = por %p125_p13, %p51_p8 }
  0x18   : > { %p831_p5 = scmp.lt.s32.totalorder %s1095_s20, 2  ;;  %p1219_p7 = por %p131_p2, %p57_p10 }
  0x19   : > { %s1217_s12 = scalar_select %p42_p0, %s1083_s17, %s44_s7  }
  0x1a   : > { %s196_s14 = sand.u32 1, %s1083_s17   ;;  %s775_s24 = sshll.u32 %s1091_s19, 3 }
  0x1b   : > { %s774_s23 = sshll.u32 %s196_s14, 3  ;;  %s204_s21 = scalar_lea.hbm %s1351_s0, %s775_s24 }
  0x1c   : > { %s200_s28 = scalar_lea.vmem [#allocation4], %s774_s23  ;;  %s206_s30 = sshll.u32 %s204_s21, 4  ;;  %s207_s30 = int_to_ptr.hbm [resolvable:$true] %s206_s30 }
  0x1d   : > { %s208_s29 = sshll.u32 %s200_s28, 4  ;;  %p820_p8 = pnand %p831_p5, %p1199_p11  ;;  %s209_s29 = int_to_ptr.vmem [resolvable:$true] %s208_s29 }
  0x1e   : > { %s197_s5 = scalar_lea.sflag [#allocation5], %s196_s14  ;;  %217 = sbr.rel (%p1180_p3) target bundleno = 981 (0x3d5), region = 32 }
  0x1f   : > { %822 = dma.hbm_to_vmem [thread:$0]  (!%p820_p8), %s207_s30, 128, %s209_s29, %s197_s5  }
  0x20   : > { %s1233_s7 = sand.u32 (!%p1180_p3), 1, %s1079_s16  }
  0x21   : > { %s777_s10 = sshll.u32 (!%p1180_p3), %s1233_s7, 3  ;;  %s220_s23 = scalar_lea.sflag (!%p1180_p3), [#allocation5], %s1233_s7 }
  0x22   : > { %s223_s24 = scalar_lea.vmem (!%p1180_p3), [#allocation4], %s777_s10 }
  0x23   : > { %1058 = dma.done.wait (%p1205_p12), %s220_s23, 128  }
  0x24   : > { %1060 = vsyncadd (%p1205_p12), %s220_s23, 4294967168 }
  0x25   : > { %1062 = dma.done.wait (%p1172_p1), [#allocation8], 256  }
  0x26   : > { %1064 = vsyncadd (%p1172_p1), [#allocation8], 4294967040  ;;  %v265_v0 = vld [vmem:[#allocation7 + $0x8] sm:$0xff]  ;;  %v264_v1 = vld [vmem:[#allocation7] sm:$0xff]  ;;  %vm270_vm0 = vcmask 130048   ;;  %vm294_vm1 = vcmask 785408  }
  0x27   : > { %288 = vmatpush.msra.mxu0 %v265_v0  ;;  %v263_v2 = vld [vmem:[%s223_s24] sm:$0xff]  ;;  %v900_v3 = vld [vmem:[%s1353_s2] ss:$0 sm:$0xff]  ;;  %s1100_s9 = smov 96   ;;  %s1101_s22 = smov 104   ;;  %vm304_vm2 = vcmask 64512  }
  0x28   : > { %s1102_s14 = smov 120   ;;  %s1103_s25 = smov 88  }
  0x29   : > { %289 = vmatpush.msra.mxu0 %v264_v1  ;;  %s1104_s27 = smov 80   ;;  %s1105_s21 = smov 72  }
  0x2a   : > { %781 = vmatmul.msk.f32.vlgmr.msra.gmra.mxu0 %vm270_vm0, %v263_v2  ;;  %s1106_s28 = smov 112   ;;  %s1107_s29 = smov 64  }
  0x2b   : > { %s1108_s30 = smov 48   ;;  %s1109_s5 = smov 56  }
  0x2c   : > { %s1110_s23 = smov 40   ;;  %s780_s24 = sshll.u32 %s1233_s7, 5 }
  0x2d   : > { %s1278_s26 = scalar_lea.vmem [#allocation10], %s780_s24  ;;  %s1111_s8 = smov 16  }
  0xa7   : > { %v291_v4 = vpop.f32.mrf.mxu0 }
  0xa8   : > { %v292_v5 = vadd.f32 %v900_v3, %v291_v4 }
  0xaa   : > { %295 = vst.msk [vmem:[#allocation2] sm:$0xff] %vm294_vm1, %v292_v5 }
  0xb1   : > { %v1250_v6 = vld [vmem:[#allocation2] sm:$0xff] }
  0xb2   : > { %302 = vrot.lane.b32.xlu0 %v1250_v6, %s1100_s9  ;;  %v299_v7 = vmul.f32 0.35355338, %v1250_v6  ;;  %s1112_s9 = smov 8  }
  0xb4   : > { %524 = vrot.lane.b32.xlu2 %v299_v7, %s1101_s22  ;;  %372 = vrot.lane.b32.xlu1 %v299_v7, %s1102_s14  ;;  %s804_s22 = sshll.u32 %s1087_s18, 5  ;;  %s637_s14 = sshll.u32 %s1278_s26, 4  ;;  %s638_s14 = int_to_ptr.vmem [resolvable:$true] %s637_s14 }
  0xba   : > { %374 = vrot.lane.b32.xlu0 %v1250_v6, %s1103_s25 }
  0xbc   : > { %450 = vrot.lane.b32.xlu2 %v1250_v6, %s1104_s27  ;;  %526 = vrot.lane.b32.xlu1 %v1250_v6, %s1105_s21  ;;  %s636_s21 = scalar_lea.hbm %s1355_s4, %s804_s22 }
  0xc2   : > { %448 = vrot.lane.b32.xlu0 %v299_v7, %s1106_s28  ;;  %s639_s28 = sshll.u32 %s636_s21, 4  ;;  %s640_s28 = int_to_ptr.hbm [resolvable:$true] %s639_s28 }
 0x10e   : > { %v525_v8 = vpop.permute.xlu2 %524 }
 0x116   : > { %v451_v9 = vpop.permute.xlu2 %450 }
 0x117   : > { %789 = vmatpush.xpose.msk.msrb.mxu0 %vm304_vm2, %v451_v9 }
 0x124   : > { %v303_v10 = vpop.permute.xlu0 %302 }
 0x125   : > { %782 = vmatpush.xpose.msk.msra.mxu1 %vm304_vm2, %v303_v10 }
 0x126   : > { %v373_v11 = vpop.permute.xlu1 %372 }
 0x128   : > { %783 = vmatmul.msk.f32.vlgmr.msra.gmra.mxu1 %vm304_vm2, %v299_v7 }
 0x12c   : > { %v375_v12 = vpop.permute.xlu0 %374 }
 0x12d   : > { %785 = vmatpush.xpose.msk.msra.mxu3 %vm304_vm2, %v375_v12 }
 0x12e   : > { %v527_v13 = vpop.permute.xlu1 %526 }
 0x130   : > { %786 = vmatmul.msk.f32.vlgmr.msra.gmra.mxu3 %vm304_vm2, %v373_v11 }
 0x131   : > { %793 = vmatpush.xpose.msk.msrb.mxu3 %vm304_vm2, %v527_v13 }
 0x134   : > { %v449_v14 = vpop.permute.xlu0 %448 }
 0x135   : > { %790 = vmatmul.msk.f32.vlgmr.msrb.gmra.mxu0 %vm304_vm2, %v449_v14 }
 0x138   : > { %794 = vmatmul.msk.f32.vlgmr.msrb.gmra.mxu3 %vm304_vm2, %v525_v8 }
 0x1a5   : > { %v327_v15 = vpop.f32.mrf.mxu1 }
 0x1a6   : > { %v330_v16 = vsel %vm304_vm2, %v327_v15, -inf }
 0x1a7   : > { %331 = vmax.xlane.f32.xlu1 %v330_v16 }
 0x1b2   : > { %v473_v19 = vpop.f32.mrf.mxu0 }
 0x1b3   : > { %v397_v17 = vpop.f32.mrf.mxu3  ;;  %v476_v21 = vsel %vm304_vm2, %v473_v19, -inf }
 0x1b4   : > { %v400_v18 = vsel %vm304_vm2, %v397_v17, -inf }
 0x1b5   : > { %401 = vmax.xlane.f32.xlu2 %v400_v18 }
 0x1bb   : > { %v549_v20 = vpop.f32.mrf.mxu3 }
 0x1bc   : > { %v552_v22 = vsel %vm304_vm2, %v549_v20, -inf }
 0x1bd   : > { %477 = vmax.xlane.f32.xlu2 %v476_v21  ;;  %553 = vmax.xlane.f32.xlu0 %v552_v22 }
 0x1d1   : > { %345 = vrot.lane.b32.xlu0 %v1250_v6, %s1107_s29  ;;  %s1113_s29 = smov 24  }
 0x1d9   : > { %492 = vrot.lane.b32.xlu0 %v1250_v6, %s1108_s30  ;;  %s609_s30 = scalar_lea.sflag [#allocation11], %s1233_s7 }
 0x21a   : > { %v332_v23 = vpop.xlane.xlu1 %331 }
 0x21b   : > { %v333_v24 = vsub.f32 %v327_v15, %v332_v23 }
 0x21d   : > { %v334_v25 = vmul.f32 1.442695, %v333_v24 }
 0x21f   : > { %901 = vpow2.f32 %v334_v25 }
 0x225   : > { %v902_v26 = vpop.eup %901 }
 0x226   : > { %v336_v27 = vsel %vm304_vm2, %v902_v26, 0.0 }
 0x227   : > { %337 = vadd.xlane.f32.xlu1 %v336_v27 }
 0x228   : > { %v402_v28 = vpop.xlane.xlu2 %401 }
 0x229   : > { %v403_v33 = vsub.f32 %v397_v17, %v402_v28 }
 0x22b   : > { %v404_v36 = vmul.f32 1.442695, %v403_v33 }
 0x230   : > { %v478_v29 = vpop.xlane.xlu2 %477  ;;  %v554_v30 = vpop.xlane.xlu0 %553 }
 0x231   : > { %v479_v31 = vsub.f32 %v473_v19, %v478_v29  ;;  %v555_v32 = vsub.f32 %v549_v20, %v554_v30 }
 0x233   : > { %v480_v34 = vmul.f32 1.442695, %v479_v31  ;;  %v556_v35 = vmul.f32 1.442695, %v555_v32 }
 0x235   : > { %903 = vpow2.f32 %v480_v34 }
 0x236   : > { %905 = vpow2.f32 %v556_v35 }
 0x237   : > { %907 = vpow2.f32 %v404_v36 }
 0x23b   : > { %v904_v37 = vpop.eup %903 }
 0x23c   : > { %v906_v38 = vpop.eup %905  ;;  %v482_v39 = vsel %vm304_vm2, %v904_v37, 0.0 }
 0x23d   : > { %483 = vadd.xlane.f32.xlu2 %v482_v39  ;;  %v558_v40 = vsel %vm304_vm2, %v906_v38, 0.0  ;;  %v908_v41 = vpop.eup %907 }
 0x23e   : > { %559 = vadd.xlane.f32.xlu1 %v558_v40  ;;  %v406_v43 = vsel %vm304_vm2, %v908_v41, 0.0 }
 0x243   : > { %v346_v42 = vpop.permute.xlu0 %345 }
 0x244   : > { %366 = vmatpush.msra.mxu2 %v346_v42 }
 0x245   : > { %407 = vadd.xlane.f32.xlu2 %v406_v43 }
 0x24b   : > { %v493_v44 = vpop.permute.xlu0 %492 }
 0x24c   : > { %513 = vmatpush.msrb.mxu1 %v493_v44 }
 0x257   : > { %416 = vrot.lane.b32.xlu1 %v1250_v6, %s1109_s5  ;;  %s991_s5 = sshra.s32 %s640_s28, 4  ;;  %s992_s5 = int_to_ptr.hbm [resolvable:$true] %s991_s5 }
 0x258   : > { %p998_p10 = scmp.lt.s32.totalorder %s992_s5, %s1355_s4 }
 0x25d   : > { %568 = vrot.lane.b32.xlu2 %v1250_v6, %s1110_s23  ;;  %s993_s23 = scalar_lea.hbm %s992_s5, 32 }
 0x25e   : > { %p994_p1 = scmp.ne.s32.totalorder %s992_s5, %s993_s23 }
 0x260   : > { %p995_p3 = pnand %p994_p1, %p1211_p4 }
 0x262   : > { %p996_p9 = pneg %p995_p3 }
 0x29a   : > { %v338_v45 = vpop.xlane.xlu1 %337 }
 0x29b   : > { %909 = vrcp.f32 %v338_v45 }
 0x2a1   : > { %v910_v46 = vpop.eup %909 }
 0x2a2   : > { %v340_v47 = vmul.f32 %v910_v46, %v338_v45 }
 0x2a4   : > { %v341_v48 = vsub.f32 2.0, %v340_v47 }
 0x2a6   : > { %v342_v49 = vmul.f32 %v910_v46, %v341_v48 }
 0x2a8   : > { %v343_v50 = vmul.f32 %v902_v26, %v342_v49 }
 0x2aa   : > { %344 = vst.msk [vmem:[%s1278_s26] sm:$0xff] %vm304_vm2, %v343_v50  ;;  %784 = vmatmul.msk.f32.vlgmr.msra.gmra.mxu2 %vm304_vm2, %v343_v50 }
 0x2b0   : > { %v484_v51 = vpop.xlane.xlu2 %483 }
 0x2b1   : > { %911 = vrcp.f32 %v484_v51  ;;  %v560_v52 = vpop.xlane.xlu1 %559 }
 0x2b2   : > { %913 = vrcp.f32 %v560_v52 }
 0x2b7   : > { %v912_v53 = vpop.eup %911 }
 0x2b8   : > { %v914_v54 = vpop.eup %913  ;;  %v486_v55 = vmul.f32 %v912_v53, %v484_v51  ;;  %v408_v56 = vpop.xlane.xlu2 %407 }
 0x2b9   : > { %v562_v57 = vmul.f32 %v914_v54, %v560_v52  ;;  %915 = vrcp.f32 %v408_v56 }
 0x2ba   : > { %v487_v58 = vsub.f32 2.0, %v486_v55 }
 0x2bb   : > { %v563_v59 = vsub.f32 2.0, %v562_v57 }
 0x2bc   : > { %v488_v60 = vmul.f32 %v912_v53, %v487_v58 }
 0x2bd   : > { %v564_v61 = vmul.f32 %v914_v54, %v563_v59 }
 0x2be   : > { %v489_v62 = vmul.f32 %v904_v37, %v488_v60 }
 0x2bf   : > { %v916_v63 = vpop.eup %915  ;;  %v565_v0 = vmul.f32 %v906_v38, %v564_v61 }
 0x2c0   : > { %791 = vst.msk [vmem:[%s1278_s26 + $0x10] sm:$0xff] %vm304_vm2, %v489_v62  ;;  %v410_v1 = vmul.f32 %v916_v63, %v408_v56  ;;  %792 = vmatmul.msk.f32.vlgmr.msrb.gmra.mxu1 %vm304_vm2, %v489_v62  ;;  %v569_v6 = vpop.permute.xlu2 %568 }
 0x2c1   : > { %795 = vst.msk [vmem:[%s1278_s26 + $0x18] sm:$0xff] %vm304_vm2, %v565_v0 }
 0x2c2   : > { %v411_v2 = vsub.f32 2.0, %v410_v1 }
 0x2c4   : > { %v412_v3 = vmul.f32 %v916_v63, %v411_v2 }
 0x2c6   : > { %v413_v4 = vmul.f32 %v908_v41, %v412_v3 }
 0x2c8   : > { %787 = vst.msk [vmem:[%s1278_s26 + $0x8] sm:$0xff] %vm304_vm2, %v413_v4 }
 0x2c9   : > { %v417_v5 = vpop.permute.xlu1 %416 }
 0x2ca   : > { %437 = vmatpush.msrb.mxu2 %v417_v5 }
 0x2cb   : > { %788 = vmatmul.msk.f32.vlgmr.msrb.gmra.mxu2 %vm304_vm2, %v413_v4 }
 0x2cc   : > { %589 = vmatpush.msra.mxu2 %v569_v6 }
 0x2d3   : > { %796 = vmatmul.msk.f32.vlgmr.msra.gmra.mxu2 %vm304_vm2, %v565_v0 }
 0x32d   : > { %v368_v7 = vpop.f32.mrf.mxu2 }
 0x32e   : > { %371 = vst.msk [vmem:[#allocation3] sm:$0xff] %vm304_vm2, %v368_v7 }
 0x33d   : > { %v515_v8 = vpop.f32.mrf.mxu1 }
 0x33e   : > { %519 = vrot.lane.b32.xlu1 %v515_v8, %s1111_s8  ;;  %s997_s8 = scalar_lea.hbm %s1355_s4, 64 }
 0x33f   : > { %p999_p11 = scmp.lt.s32.totalorder %s997_s8, %s993_s23 }
 0x341   : > { %p1000_p12 = por %p999_p11, %p998_p10 }
 0x343   : > { %p1001_p13 = pnand %p1000_p12, %p996_p9 }
 0x34e   : > { %v439_v9 = vpop.f32.mrf.mxu2 }
 0x34f   : > { %443 = vrot.lane.b32.xlu0 %v439_v9, %s1112_s9 }
 0x356   : > { %v591_v10 = vpop.f32.mrf.mxu2 }
 0x357   : > { %595 = vrot.lane.b32.xlu0 %v591_v10, %s1113_s29 }
 0x358   : > { %1004 = shalt.err (!%p1001_p13)
}
 0x359   : > { %s1114_s27 = smov 128   ;;  %vm446_vm3 = vcmask 130112   ;;  %vm522_vm4 = vcmask 195712   ;;  %vm598_vm5 = vcmask 261312   ;;  %s799_s21 = sshll.u32 %s1087_s18, 3  ;;  %vm601_vm6 = vcmask 261120  }
 0x35a   : > { %812 = dma.vmem_to_hbm [thread:$0]  (%p1211_p4), %s638_s14, 512, %s640_s28, %s609_s30, %s1114_s27, %s1114_s27, %s1112_s9  }
 0x35b   : > { %s620_s23 = scalar_lea.hbm %s1354_s3, %s799_s21  ;;  %s251_s24 = scalar_lea.vmem [#allocation9], %s777_s10 }
 0x35c   : > { %s622_s26 = sshll.u32 %s251_s24, 4  ;;  %s624_s9 = sshll.u32 %s620_s23, 4  ;;  %s623_s26 = int_to_ptr.vmem [resolvable:$true] %s622_s26  ;;  %s625_s9 = int_to_ptr.hbm [resolvable:$true] %s624_s9 }
 0x35d   : > { %s604_s14 = scalar_lea.sflag [#allocation6], %s1233_s7  ;;  %s1019_s28 = sshra.s32 %s625_s9, 4  ;;  %s1020_s28 = int_to_ptr.hbm [resolvable:$true] %s1019_s28 }
 0x35e   : > { %s1021_s18 = scalar_lea.hbm %s1020_s28, 8  ;;  %s1025_s25 = scalar_lea.hbm %s1354_s3, 16 }
 0x35f   : > { %p1022_p0 = scmp.ne.s32.totalorder %s1020_s28, %s1021_s18  ;;  %p1026_p8 = scmp.lt.s32.totalorder %s1020_s28, %s1354_s3 }
 0x360   : > { %p1027_p1 = scmp.lt.s32.totalorder %s1025_s25, %s1021_s18 }
 0x361   : > { %p1023_p2 = pnand %p1022_p0, %p1211_p4 }
 0x362   : > { %p1028_p3 = por %p1027_p1, %p1026_p8 }
 0x363   : > { %p1024_p5 = pneg %p1023_p2 }
 0x365   : > { %p1029_p9 = pnand %p1028_p3, %p1024_p5 }
 0x3b0   : > { %v520_v12 = vpop.permute.xlu1 %519 }
 0x3c1   : > { %v444_v11 = vpop.permute.xlu0 %443 }
 0x3c2   : > { %447 = vst.msk [vmem:[#allocation3] sm:$0xff] %vm446_vm3, %v444_v11 }
 0x3c3   : > { %523 = vst.msk [vmem:[#allocation3] sm:$0xff] %vm522_vm4, %v520_v12 }
 0x3c9   : > { %v596_v13 = vpop.permute.xlu0 %595 }
 0x3ca   : > { %599 = vst.msk [vmem:[#allocation3] sm:$0xff] %vm598_vm5, %v596_v13 }
 0x3d1   : > { %v600_v14 = vld [vmem:[#allocation3] sm:$0xff] }
 0x3d2   : > { %602 = vst.msk [vmem:[%s251_s24] sm:$0xff] %vm601_vm6, %v600_v14 }
 0x3d3   : > { %1032 = shalt.err (!%p1029_p9)
}
 0x3d4   : > { %811 = dma.vmem_to_hbm [thread:$0]  (%p1211_p4), %s623_s26, 128, %s625_s9, %s604_s14  }
 0x3d5 PF: > { %s654_s7 = sand.u32 1, %s1075_s15   ;;  %p824_p10 = pnand %p773_p6, %p1219_p7 }
 0x3d6   : > { %s655_s27 = scalar_lea.sflag [#allocation6], %s654_s7 }
 0x3d7   : > { %p825_p11 = pneg %p824_p10 }
 0x3d9   : > { %1066 = dma.done.wait (%p825_p11), %s655_s27, 128  }
 0x3da   : > { %1068 = vsyncadd (%p825_p11), %s655_s27, 4294967168  ;;  %s665_s21 = scalar_lea.sflag [#allocation11], %s654_s7 }
 0x3db   : > { %1070 = dma.done.wait (%p825_p11), %s665_s21, 512  }
 0x3dc   : > { %1072 = vsyncadd (%p825_p11), %s665_s21, 4294966784  ;;  %s25_s20 = sadd.s32 1, %s1095_s20   ;;  %s1362_s15 = smov %s1079_s16 }
 0x3dd   : > { %p22_p12 = scmp.ge.s32.totalorder %s25_s20, 4   ;;  %s1363_s16 = smov %s1083_s17 }
 0x3de   : > { %s1364_s17 = smov %s1217_s12  ;;  %s1365_s18 = smov %s1091_s19 }
 0x3df   : > { %s1366_s19 = smov %s1368_s6  ;;  %24 = sbr.rel (!%p22_p12) target bundleno = 9 (0x9), region = 106 }
 0x3e4   :  { %671 = vsyncpa [#allocation5], 1 }
 0x3e5   :  { %673 = vsyncpa [#allocation5 + $0x1], 1 }
 0x3e6   :  { %674 = vsyncpa [#allocation8], 1 }
 0x3e7   :  { %675 = vsyncpa [#allocation6], 1 }
 0x3e8   :  { %677 = vsyncpa [#allocation6 + $0x1], 1 }
 0x3e9   :  { %678 = vsyncpa [#allocation11], 1 }
 0x3ea   :  { %680 = vsyncpa [#allocation11 + $0x1], 1 }

</bundles_post_ra>
